<compile_context>
chip_gen: v7x
topology: tpu7x:2x2x1
jax: 0.10.0
libtpu: 0.0.40
codegen_flags: <defaults>
</compile_context>

<pallas_src>
import functools
import math

import jax
import jax.numpy as jnp
from jax.experimental import pallas as pl
from jax.experimental.pallas import tpu as pltpu


# ---------------------------------------------------------------------------
# Kernel 1: flash-style context kernel (no (S, S) materialization).
# Emits context and per-row lse = m + log(l) for reuse by the probs kernel.
# ---------------------------------------------------------------------------
def _flash_ctx_kernel(q_ref, k_ref, v_ref, o_ref, lse_ref,
                      qs_sc, m_sc, l_sc, acc_sc, *, scale, mxu_dtype):
    kv = pl.program_id(2)

    @pl.when(kv == 0)
    def _init():
        # The Q tile is resident across the whole KV loop (its block index does
        # not depend on kv), so scale it in f32 and cast to the MXU operand
        # dtype exactly once per (batch*head, q-tile) instead of every KV step.
        qs_sc[...] = (q_ref[0].astype(jnp.float32) * scale).astype(mxu_dtype)
        m_sc[...] = jnp.full_like(m_sc, -jnp.inf)
        l_sc[...] = jnp.zeros_like(l_sc)
        acc_sc[...] = jnp.zeros_like(acc_sc)

    # Q @ K^T as a contraction over the last axes (no K-tile transpose);
    # low-precision operands when requested, always f32 accumulation.
    s = jax.lax.dot_general(
        qs_sc[...],
        k_ref[0].astype(mxu_dtype),
        dimension_numbers=(((1,), (1,)), ((), ())),
        preferred_element_type=jnp.float32,
    )  # (tq, tk) f32

    m_prev = m_sc[...]
    m_new = jnp.maximum(m_prev, jnp.max(s, axis=-1, keepdims=True))
    alpha = jnp.exp(m_prev - m_new)
    p = jnp.exp(s - m_new)

    l_sc[...] = alpha * l_sc[...] + jnp.sum(p, axis=-1, keepdims=True)
    acc_sc[...] = alpha * acc_sc[...] + jnp.dot(
        p.astype(mxu_dtype),
        v_ref[0].astype(mxu_dtype),
        preferred_element_type=jnp.float32,
    )
    m_sc[...] = m_new

    @pl.when(kv == pl.num_programs(2) - 1)
    def _finalize():
        # Exact division (not approx reciprocal): runs once per (tq, Dv) tile
        # and keeps 1e-5-level agreement with the reference softmax.
        o_ref[0] = (acc_sc[...] / l_sc[...]).astype(o_ref.dtype)
        lse_ref[0] = m_sc[...] + jnp.log(l_sc[...])


# ---------------------------------------------------------------------------
# Kernel 2: streaming softmax-probability kernel, tiled over the KV axis and
# reusing the lse produced by the flash pass:  attn = exp(Q K^T / sqrt(dk) - lse).
# Pure writeback-bound; VMEM footprint is independent of S.
# ---------------------------------------------------------------------------
def _attn_probs_kernel(q_ref, k_ref, lse_ref, attn_ref, *, scale, mxu_dtype):
    # The (tq, tk) store dominates this kernel, so the per-step Q scaling is
    # free filler on the VPU.
    q = (q_ref[0].astype(jnp.float32) * scale).astype(mxu_dtype)
    s = jax.lax.dot_general(
        q,
        k_ref[0].astype(mxu_dtype),
        dimension_numbers=(((1,), (1,)), ((), ())),
        preferred_element_type=jnp.float32,
    )  # (tq, tk) f32
    attn_ref[0] = jnp.exp(s - lse_ref[0]).astype(attn_ref.dtype)


# ---------------------------------------------------------------------------
# Wrapper helpers
# ---------------------------------------------------------------------------
def _choose_tile(s, preferred, granularity=8):
    """Largest candidate <= preferred that divides s and is a multiple of
    `granularity`; falls back to the full extent (always a legal block)."""
    cands = [preferred] + [c for c in (1024, 512, 256, 128, 64, 32, 16, 8)
                           if c < preferred]
    for t in cands:
        if t <= s and s % t == 0 and t % granularity == 0:
            return t
    return s


def _physical_vmem_bytes():
    try:
        return int(pltpu.get_tpu_info().vmem_capacity_bytes)
    except Exception:
        # Conservative fallback: v7x has the smallest per-TensorCore VMEM.
        return 64 * 1024 * 1024


def _vmem_limit(estimate_bytes):
    # Leave ~25% of the physical per-core VMEM as headroom for the rest of the
    # program; never request more than the chip has (the old 100 MiB cap
    # exceeded v7x's 64 MiB).
    ceiling = (_physical_vmem_bytes() * 3) // 4
    want = max(2 * int(estimate_bytes), 32 * 1024 * 1024)
    return int(min(ceiling, want))


# ---------------------------------------------------------------------------
# Public wrapper
# ---------------------------------------------------------------------------
def scaled_dot_product_attention(Q, K, V, return_attn=True, tq=None, tk=None,
                                 mxu_dtype=None, attn_dtype=None):
    """Q, K: [B, H, S, Dk]; V: [B, H, S, Dv]. Returns (context, attn).

    mxu_dtype:  dtype of the MXU operands (default: input dtype).  Pass
                jnp.bfloat16 for full-rate MXU when inputs are f32.
    attn_dtype: dtype of the returned attention probabilities (default: Q.dtype);
                bf16 halves the S^2 writeback.
    """
    B, H, S, Dk = Q.shape
    Dv = V.shape[-1]
    BH = B * H

    q = Q.reshape(BH, S, Dk)
    k = K.reshape(BH, S, Dk)
    v = V.reshape(BH, S, Dv)

    scale = 1.0 / math.sqrt(Dk)
    mxu_dtype = jnp.dtype(mxu_dtype) if mxu_dtype is not None else jnp.dtype(Q.dtype)
    attn_dtype = jnp.dtype(attn_dtype) if attn_dtype is not None else jnp.dtype(Q.dtype)
    dsz = jnp.dtype(Q.dtype).itemsize
    msz = mxu_dtype.itemsize
    lane = 128  # f32 scratch / lse columns pad to the 128-lane vreg width

    # Tile sizes: large Q tiles (arithmetic intensity ~ 2*tq/dsz flop/B of the
    # KV stream) with modest KV chunks keep the (tq, tk) f32 intermediates
    # small while staying MXU-bound on v6e/v7x.  Shrunk automatically for
    # short sequences.
    tq = tq if tq is not None else _choose_tile(S, 512)
    tk = tk if tk is not None else _choose_tile(S, 256)
    nq, nk = S // tq, S // tk

    # ---- context (flash) kernel -------------------------------------------
    ctx_est = (
        2 * (tq * Dk + tk * Dk + tk * Dv) * dsz          # double-buffered inputs
        + 2 * tq * Dv * dsz + 2 * tq * lane * 4          # double-buffered ctx + lse out
        + tq * Dk * msz                                  # scaled-Q scratch
        + (2 * tq * lane + tq * max(Dv, lane)) * 4       # m / l / acc f32 scratch
    )
    ctx, lse = pl.pallas_call(
        functools.partial(_flash_ctx_kernel, scale=scale, mxu_dtype=mxu_dtype),
        out_shape=(
            jax.ShapeDtypeStruct((BH, S, Dv), Q.dtype),
            jax.ShapeDtypeStruct((BH, S, 1), jnp.float32),
        ),
        grid_spec=pltpu.PrefetchScalarGridSpec(
            num_scalar_prefetch=0,
            grid=(BH, nq, nk),
            in_specs=[
                pl.BlockSpec((1, tq, Dk), lambda b, i, j: (b, i, 0)),
                pl.BlockSpec((1, tk, Dk), lambda b, i, j: (b, j, 0)),
                pl.BlockSpec((1, tk, Dv), lambda b, i, j: (b, j, 0)),
            ],
            out_specs=[
                pl.BlockSpec((1, tq, Dv), lambda b, i, j: (b, i, 0)),
                pl.BlockSpec((1, tq, 1), lambda b, i, j: (b, i, 0)),
            ],
            scratch_shapes=[
                pltpu.VMEM((tq, Dk), mxu_dtype),    # scaled Q (hoisted out of KV loop)
                pltpu.VMEM((tq, 1), jnp.float32),   # running max
                pltpu.VMEM((tq, 1), jnp.float32),   # running sum
                pltpu.VMEM((tq, Dv), jnp.float32),  # f32 accumulator
            ],
        ),
        compiler_params=pltpu.CompilerParams(
            # KV reduction axis innermost / "arbitrary"; (BH, nq) parallel for
            # megacore sharding on v7x.
            dimension_semantics=("parallel", "parallel", "arbitrary"),
            vmem_limit_bytes=_vmem_limit(ctx_est),
        ),
    )(q, k, v)
    ctx = ctx.reshape(B, H, S, Dv)

    if not return_attn:
        return ctx, None

    # ---- attention-probability kernel (KV-tiled, reuses flash lse) ---------
    # The (tq, tk_p) output block's last dim must be a multiple of 128 (or the
    # full S) to keep stores lane-dense and satisfy the (8, 128) rule.
    tk_p = tk if (tk % 128 == 0 or tk == S) else _choose_tile(S, 256, granularity=128)
    nk_p = S // tk_p

    attn_est = (
        2 * (tq * Dk + tk_p * Dk) * dsz                  # double-buffered Q/K tiles
        + 2 * tq * lane * 4                              # lse tile
        + 2 * tq * tk_p * attn_dtype.itemsize            # double-buffered output tile
    )
    attn = pl.pallas_call(
        functools.partial(_attn_probs_kernel, scale=scale, mxu_dtype=mxu_dtype),
        out_shape=jax.ShapeDtypeStruct((BH, S, S), attn_dtype),
        grid_spec=pltpu.PrefetchScalarGridSpec(
            num_scalar_prefetch=0,
            grid=(BH, nq, nk_p),
            in_specs=[
                pl.BlockSpec((1, tq, Dk), lambda b, i, j: (b, i, 0)),
                pl.BlockSpec((1, tk_p, Dk), lambda b, i, j: (b, j, 0)),
                pl.BlockSpec((1, tq, 1), lambda b, i, j: (b, i, 0)),
            ],
            out_specs=pl.BlockSpec((1, tq, tk_p), lambda b, i, j: (b, i, j)),
        ),
        compiler_params=pltpu.CompilerParams(
            dimension_semantics=("parallel", "parallel", "parallel"),
            vmem_limit_bytes=_vmem_limit(attn_est),
        ),
    )(q, k, lse)
    attn = attn.reshape(B, H, S, S)

    return ctx, attn


# ---------------------------------------------------------------------------
# Reference + test
# ---------------------------------------------------------------------------
def _reference(Q, K, V):
    Dk = Q.shape[-1]
    scores = jnp.einsum("bhqd,bhkd->bhqk", Q, K) / math.sqrt(Dk)
    attn = jax.nn.softmax(scores, axis=-1)
    ctx = jnp.einsum("bhqk,bhkd->bhqd", attn, V)
    return ctx, attn


def _check(ctx, attn, ctx_ref, attn_ref, tol):
    assert jnp.allclose(ctx, ctx_ref, atol=tol, rtol=tol), "context mismatch"
    assert jnp.allclose(attn, attn_ref, atol=tol, rtol=tol), "attn mismatch"


if __name__ == "__main__":
    key = jax.random.PRNGKey(0)

    # Case 1: tiny shapes matching the module's typical usage
    # (batch=2, heads=4, seq=8, d_k=d_v=32) -> single-block fast path.
    B, H, S, Dk, Dv = 2, 4, 8, 32, 32
    kq, kk, kv = jax.random.split(key, 3)
    Q = jax.random.normal(kq, (B, H, S, Dk), dtype=jnp.float32)
    K = jax.random.normal(kk, (B, H, S, Dk), dtype=jnp.float32)
    V = jax.random.normal(kv, (B, H, S, Dv), dtype=jnp.float32)

    ctx, attn = scaled_dot_product_attention(Q, K, V)
    jax.block_until_ready((ctx, attn))
    ctx_ref, attn_ref = _reference(Q, K, V)
    _check(ctx, attn, ctx_ref, attn_ref, tol=2e-5)

    # Case 2: forces multiple Q tiles and multiple KV chunks so the online
    # softmax (pl.when init/finalize), the lse handoff and the KV-tiled probs
    # kernel are all exercised.
    B2, H2, S2, D2 = 1, 2, 256, 128
    k2q, k2k, k2v = jax.random.split(jax.random.PRNGKey(0), 3)
    Q2 = jax.random.normal(k2q, (B2, H2, S2, D2), dtype=jnp.float32)
    K2 = jax.random.normal(k2k, (B2, H2, S2, D2), dtype=jnp.float32)
    V2 = jax.random.normal(k2v, (B2, H2, S2, D2), dtype=jnp.float32)

    ctx2, attn2 = scaled_dot_product_attention(Q2, K2, V2, tq=64, tk=128)
    jax.block_until_ready((ctx2, attn2))
    ctx2_ref, attn2_ref = _reference(Q2, K2, V2)
    _check(ctx2, attn2, ctx2_ref, attn2_ref, tol=2e-5)

    # Case 3: bf16 inputs -> full-rate MXU operands with f32 accumulation
    # (the bf16-friendly path from the review), looser tolerance.
    Q3, K3, V3 = (Q2.astype(jnp.bfloat16), K2.astype(jnp.bfloat16),
                  V2.astype(jnp.bfloat16))
    ctx3, attn3 = scaled_dot_product_attention(Q3, K3, V3)
    jax.block_until_ready((ctx3, attn3))
    ctx3_ref, attn3_ref = _reference(Q3.astype(jnp.float32),
                                     K3.astype(jnp.float32),
                                     V3.astype(jnp.float32))
    _check(ctx3.astype(jnp.float32), attn3.astype(jnp.float32),
           ctx3_ref, attn3_ref, tol=2e-2)

    print("KERNEL_OK")
</pallas_src>

<mosaic_0001>
module attributes {stable_mosaic.version = 11 : i64} {
  func.func @_flash_ctx_kernel(%arg0: i32, %arg1: i32, %arg2: i32, %arg3: memref<1x8x32xf32, #tpu.memory_space<vmem>>, %arg4: memref<1x8x32xf32, #tpu.memory_space<vmem>>, %arg5: memref<1x8x32xf32, #tpu.memory_space<vmem>>, %arg6: memref<1x8x32xf32, #tpu.memory_space<vmem>>, %arg7: memref<1x8x1xf32, #tpu.memory_space<vmem>>, %arg8: memref<8x32xf32, #tpu.memory_space<vmem>>, %arg9: memref<8x1xf32, #tpu.memory_space<vmem>>, %arg10: memref<8x1xf32, #tpu.memory_space<vmem>>, %arg11: memref<8x32xf32, #tpu.memory_space<vmem>>) attributes {dimension_semantics = [#tpu.dimension_semantics<parallel>, #tpu.dimension_semantics<parallel>, #tpu.dimension_semantics<arbitrary>], iteration_bounds = array<i64: 8, 1, 1>, scalar_prefetch = 0 : i64, scratch_operands = 4 : i64, tpu.core_type = #tpu.core_type<tc>, window_params = [{transform_indices = @transform_0, window_bounds = array<i64: 1, 8, 32>}, {transform_indices = @transform_1, window_bounds = array<i64: 1, 8, 32>}, {transform_indices = @transform_2, window_bounds = array<i64: 1, 8, 32>}, {transform_indices = @transform_3, window_bounds = array<i64: 1, 8, 32>}, {transform_indices = @transform_4, window_bounds = array<i64: 1, 8, 1>}]} {
    %c0_i32 = arith.constant 0 : i32
    %0 = arith.cmpi eq, %arg2, %c0_i32 : i32
    %1 = arith.extui %0 : i1 to i32
    %c0_i32_0 = arith.constant 0 : i32
    %2 = arith.cmpi ne, %1, %c0_i32_0 : i32
    scf.if %2 {
      %c0_25 = arith.constant 0 : index
      %c0_26 = arith.constant 0 : index
      %c0_27 = arith.constant 0 : index
      %34 = vector.load %arg3[%c0_25, %c0_26, %c0_27] : memref<1x8x32xf32, #tpu.memory_space<vmem>>, vector<1x8x32xf32>
      %35 = vector.shape_cast %34 : vector<1x8x32xf32> to vector<8x32xf32>
      %cst_28 = arith.constant 0.176776692 : f32
      %36 = vector.broadcast %cst_28 : f32 to vector<8x32xf32>
      %37 = arith.mulf %35, %36 : vector<8x32xf32>
      %c0_29 = arith.constant 0 : index
      %c0_30 = arith.constant 0 : index
      %38 = vector.load %arg8[%c0_29, %c0_30] : memref<8x32xf32, #tpu.memory_space<vmem>>, vector<8x32xf32>
      tpu.vector_store %arg8[%c0_29, %c0_30], %37 {strides = array<i32>} : memref<8x32xf32, #tpu.memory_space<vmem>>, vector<8x32xf32>,
      %cst_31 = arith.constant 0xFF800000 : f32
      %39 = vector.broadcast %cst_31 : f32 to vector<8x1xf32>
      %c0_32 = arith.constant 0 : index
      %c0_33 = arith.constant 0 : index
      %40 = vector.load %arg9[%c0_32, %c0_33] : memref<8x1xf32, #tpu.memory_space<vmem>>, vector<8x1xf32>
      tpu.vector_store %arg9[%c0_32, %c0_33], %39 {strides = array<i32>} : memref<8x1xf32, #tpu.memory_space<vmem>>, vector<8x1xf32>,
      %cst_34 = arith.constant 0.000000e+00 : f32
      %41 = vector.broadcast %cst_34 : f32 to vector<8x1xf32>
      %c0_35 = arith.constant 0 : index
      %c0_36 = arith.constant 0 : index
      %42 = vector.load %arg10[%c0_35, %c0_36] : memref<8x1xf32, #tpu.memory_space<vmem>>, vector<8x1xf32>
      tpu.vector_store %arg10[%c0_35, %c0_36], %41 {strides = array<i32>} : memref<8x1xf32, #tpu.memory_space<vmem>>, vector<8x1xf32>,
      %cst_37 = arith.constant 0.000000e+00 : f32
      %43 = vector.broadcast %cst_37 : f32 to vector<8x32xf32>
      %c0_38 = arith.constant 0 : index
      %c0_39 = arith.constant 0 : index
      %44 = vector.load %arg11[%c0_38, %c0_39] : memref<8x32xf32, #tpu.memory_space<vmem>>, vector<8x32xf32>
      tpu.vector_store %arg11[%c0_38, %c0_39], %43 {strides = array<i32>} : memref<8x32xf32, #tpu.memory_space<vmem>>, vector<8x32xf32>,
    } else {
    }
    %c0 = arith.constant 0 : index
    %c0_1 = arith.constant 0 : index
    %3 = vector.load %arg8[%c0, %c0_1] : memref<8x32xf32, #tpu.memory_space<vmem>>, vector<8x32xf32>
    %c0_2 = arith.constant 0 : index
    %c0_3 = arith.constant 0 : index
    %c0_4 = arith.constant 0 : index
    %4 = vector.load %arg4[%c0_2, %c0_3, %c0_4] : memref<1x8x32xf32, #tpu.memory_space<vmem>>, vector<1x8x32xf32>
    %5 = vector.shape_cast %4 : vector<1x8x32xf32> to vector<8x32xf32>
    %cst = arith.constant dense<0.000000e+00> : vector<8x8xf32>
    %6 = tpu.matmul %3, %5, %cst {dimension_numbers = #tpu.dot_dimension_numbers<[1], [1], [0], [0], [0, 0, 1, 0], [], []>} : vector<8x32xf32>, vector<8x32xf32>, vector<8x8xf32> -> vector<8x8xf32>
    %c0_5 = arith.constant 0 : index
    %c0_6 = arith.constant 0 : index
    %7 = vector.load %arg9[%c0_5, %c0_6] : memref<8x1xf32, #tpu.memory_space<vmem>>, vector<8x1xf32>
    %cst_7 = arith.constant dense<0xFF800000> : vector<8xf32>
    %8 = vector.multi_reduction <maximumf>, %6, %cst_7 [1] : vector<8x8xf32> to vector<8xf32>
    %9 = vector.shape_cast %8 : vector<8xf32> to vector<8x1xf32>
    %10 = arith.maximumf %7, %9 : vector<8x1xf32>
    %11 = arith.subf %7, %10 : vector<8x1xf32>
    %12 = math.exp %11 : vector<8x1xf32>
    %13 = vector.broadcast %10 : vector<8x1xf32> to vector<8x8xf32>
    %14 = arith.subf %6, %13 : vector<8x8xf32>
    %15 = math.exp %14 : vector<8x8xf32>
    %c0_8 = arith.constant 0 : index
    %c0_9 = arith.constant 0 : index
    %16 = vector.load %arg10[%c0_8, %c0_9] : memref<8x1xf32, #tpu.memory_space<vmem>>, vector<8x1xf32>
    %17 = arith.mulf %12, %16 : vector<8x1xf32>
    %cst_10 = arith.constant dense<0.000000e+00> : vector<8xf32>
    %18 = vector.multi_reduction <add>, %15, %cst_10 [1] : vector<8x8xf32> to vector<8xf32>
    %19 = vector.shape_cast %18 : vector<8xf32> to vector<8x1xf32>
    %20 = arith.addf %17, %19 : vector<8x1xf32>
    %c0_11 = arith.constant 0 : index
    %c0_12 = arith.constant 0 : index
    %21 = vector.load %arg10[%c0_11, %c0_12] : memref<8x1xf32, #tpu.memory_space<vmem>>, vector<8x1xf32>
    tpu.vector_store %arg10[%c0_11, %c0_12], %20 {strides = array<i32>} : memref<8x1xf32, #tpu.memory_space<vmem>>, vector<8x1xf32>,
    %c0_13 = arith.constant 0 : index
    %c0_14 = arith.constant 0 : index
    %22 = vector.load %arg11[%c0_13, %c0_14] : memref<8x32xf32, #tpu.memory_space<vmem>>, vector<8x32xf32>
    %23 = vector.broadcast %12 : vector<8x1xf32> to vector<8x32xf32>
    %24 = arith.mulf %23, %22 : vector<8x32xf32>
    %c0_15 = arith.constant 0 : index
    %c0_16 = arith.constant 0 : index
    %c0_17 = arith.constant 0 : index
    %25 = vector.load %arg5[%c0_15, %c0_16, %c0_17] : memref<1x8x32xf32, #tpu.memory_space<vmem>>, vector<1x8x32xf32>
    %26 = vector.shape_cast %25 : vector<1x8x32xf32> to vector<8x32xf32>
    %cst_18 = arith.constant dense<0.000000e+00> : vector<8x32xf32>
    %27 = tpu.matmul %15, %26, %cst_18 {dimension_numbers = #tpu.dot_dimension_numbers<[1], [0], [0], [1], [0, 0, 1, 1], [], []>} : vector<8x8xf32>, vector<8x32xf32>, vector<8x32xf32> -> vector<8x32xf32>
    %28 = arith.addf %24, %27 : vector<8x32xf32>
    %c0_19 = arith.constant 0 : index
    %c0_20 = arith.constant 0 : index
    %29 = vector.load %arg11[%c0_19, %c0_20] : memref<8x32xf32, #tpu.memory_space<vmem>>, vector<8x32xf32>
    tpu.vector_store %arg11[%c0_19, %c0_20], %28 {strides = array<i32>} : memref<8x32xf32, #tpu.memory_space<vmem>>, vector<8x32xf32>,
    %c0_21 = arith.constant 0 : index
    %c0_22 = arith.constant 0 : index
    %30 = vector.load %arg9[%c0_21, %c0_22] : memref<8x1xf32, #tpu.memory_space<vmem>>, vector<8x1xf32>
    tpu.vector_store %arg9[%c0_21, %c0_22], %10 {strides = array<i32>} : memref<8x1xf32, #tpu.memory_space<vmem>>, vector<8x1xf32>,
    %c0_i32_23 = arith.constant 0 : i32
    %31 = arith.cmpi eq, %arg2, %c0_i32_23 : i32
    %32 = arith.extui %31 : i1 to i32
    %c0_i32_24 = arith.constant 0 : i32
    %33 = arith.cmpi ne, %32, %c0_i32_24 : i32
    scf.if %33 {
      %c0_25 = arith.constant 0 : index
      %c0_26 = arith.constant 0 : index
      %34 = vector.load %arg11[%c0_25, %c0_26] : memref<8x32xf32, #tpu.memory_space<vmem>>, vector<8x32xf32>
      %c0_27 = arith.constant 0 : index
      %c0_28 = arith.constant 0 : index
      %35 = vector.load %arg10[%c0_27, %c0_28] : memref<8x1xf32, #tpu.memory_space<vmem>>, vector<8x1xf32>
      %36 = vector.broadcast %35 : vector<8x1xf32> to vector<8x32xf32>
      %37 = arith.divf %34, %36 : vector<8x32xf32>
      %c0_29 = arith.constant 0 : index
      %c0_30 = arith.constant 0 : index
      %c0_31 = arith.constant 0 : index
      %38 = vector.load %arg6[%c0_29, %c0_30, %c0_31] : memref<1x8x32xf32, #tpu.memory_space<vmem>>, vector<1x8x32xf32>
      %39 = vector.shape_cast %38 : vector<1x8x32xf32> to vector<8x32xf32>
      %40 = vector.shape_cast %37 : vector<8x32xf32> to vector<1x8x32xf32>
      tpu.vector_store %arg6[%c0_29, %c0_30, %c0_31], %40 {strides = array<i32>} : memref<1x8x32xf32, #tpu.memory_space<vmem>>, vector<1x8x32xf32>,
      %c0_32 = arith.constant 0 : index
      %c0_33 = arith.constant 0 : index
      %41 = vector.load %arg9[%c0_32, %c0_33] : memref<8x1xf32, #tpu.memory_space<vmem>>, vector<8x1xf32>
      %c0_34 = arith.constant 0 : index
      %c0_35 = arith.constant 0 : index
      %42 = vector.load %arg10[%c0_34, %c0_35] : memref<8x1xf32, #tpu.memory_space<vmem>>, vector<8x1xf32>
      %43 = math.log %42 : vector<8x1xf32>
      %44 = arith.addf %41, %43 : vector<8x1xf32>
      %c0_36 = arith.constant 0 : index
      %c0_37 = arith.constant 0 : index
      %c0_38 = arith.constant 0 : index
      %45 = vector.load %arg7[%c0_36, %c0_37, %c0_38] : memref<1x8x1xf32, #tpu.memory_space<vmem>>, vector<1x8x1xf32>
      %46 = vector.shape_cast %45 : vector<1x8x1xf32> to vector<8x1xf32>
      %47 = vector.shape_cast %44 : vector<8x1xf32> to vector<1x8x1xf32>
      tpu.vector_store %arg7[%c0_36, %c0_37, %c0_38], %47 {strides = array<i32>} : memref<1x8x1xf32, #tpu.memory_space<vmem>>, vector<1x8x1xf32>,
    } else {
    }
    return
  }
  func.func @transform_0(%arg0: i32, %arg1: i32, %arg2: i32) -> (i32, i32, i32) {
    %c0_i32 = arith.constant 0 : i32
    %c0_i32_0 = arith.constant 0 : i32
    return %arg0, %arg1, %c0_i32 : i32, i32, i32
  }
  func.func @transform_1(%arg0: i32, %arg1: i32, %arg2: i32) -> (i32, i32, i32) {
    %c0_i32 = arith.constant 0 : i32
    %c0_i32_0 = arith.constant 0 : i32
    return %arg0, %arg2, %c0_i32 : i32, i32, i32
  }
  func.func @transform_2(%arg0: i32, %arg1: i32, %arg2: i32) -> (i32, i32, i32) {
    %c0_i32 = arith.constant 0 : i32
    %c0_i32_0 = arith.constant 0 : i32
    return %arg0, %arg2, %c0_i32 : i32, i32, i32
  }
  func.func @transform_3(%arg0: i32, %arg1: i32, %arg2: i32) -> (i32, i32, i32) {
    %c0_i32 = arith.constant 0 : i32
    %c0_i32_0 = arith.constant 0 : i32
    return %arg0, %arg1, %c0_i32 : i32, i32, i32
  }
  func.func @transform_4(%arg0: i32, %arg1: i32, %arg2: i32) -> (i32, i32, i32) {
    %c0_i32 = arith.constant 0 : i32
    %c0_i32_0 = arith.constant 0 : i32
    return %arg0, %arg1, %c0_i32 : i32, i32, i32
  }
}

</mosaic_0001>

<bundles_post_ra>
// kernel: tpu_custom_call.1
= control target key start
LH: loop header
LB: loop body
LE: loop exit
PB: predicated region body
PF: predicated region fallthrough
CT: control target
= control target key end

     0   :  { %s1351_s0 = inlined_call_operand.hbm [shape: f32[8,8,32], index: 0, kind: input, shape index: {}]   ;;  %s1352_s1 = inlined_call_operand.hbm [shape: f32[8,8,32], index: 1, kind: input, shape index: {}]   ;;  %s1353_s2 = inlined_call_operand.hbm [shape: f32[8,8,32], index: 2, kind: input, shape index: {}]   ;;  %s1354_s3 = inlined_call_operand.hbm [shape: f32[8,8,32], index: 3, kind: output, shape index: {0}]   ;;  %s1355_s4 = inlined_call_operand.vmem [shape: f32[8,8,1], index: 4, kind: output, shape index: {1}]  }
   0x1   :  { %1363 = sst [smem:[#allocation20_spill]] %s1352_s1 }
   0x2   :  { %10 = vsyncpa [#allocation7], 0 }
   0x3   :  { %12 = vsyncpa [#allocation7 + $0x1], 0 }
   0x4   :  { %13 = vsyncpa [#allocation10], 0 }
   0x5   :  { %15 = vsyncpa [#allocation10 + $0x1], 0 }
   0x6   :  { %16 = vsyncpa [#allocation8], 0 }
   0x7   :  { %18 = vsyncpa [#allocation8 + $0x1], 0  ;;  %s1070_s15 = smov 0   ;;  %s1072_s16 = smov 0  }
   0x8   :  { %s1074_s17 = smov 0   ;;  %s1076_s18 = smov 0  }
   0x9   :  { %s1078_s19 = smov 0   ;;  %s1080_s20 = smov 0  }
   0xa LB: > { %1364 = sst [smem:[#allocation16_spill]] %s1031_s19  ;;  %s1101_s21 = sadd.s32 4294967295, %s1035_s20   ;;  %s1035_s20 = sphi %s1080_s20, %s24_s20   ;;  %s1031_s19 = sphi %s1078_s19, %s1387_s19   ;;  %s1027_s18 = sphi %s1076_s18, %s1386_s18   ;;  %s1023_s17 = sphi %s1074_s17, %s1390_s17   ;;  %s1019_s16 = sphi %s1072_s16, %s1389_s16   ;;  %s1015_s15 = sphi %s1070_s15, %s1388_s15  }
   0xb   : > { %s737_s22 = sadd.s32 4294967294, %s1035_s20   ;;  %s43_s23 = sadd.s32 1, %s1031_s19 }
   0xc   : > { %s52_s24 = sadd.s32 1, %s1023_s17  ;;  %p45_p0 = scmp.ge.s32.totalorder %s43_s23, 8 }
   0xd   : > { %p59_p1 = scmp.ne.s32.totalorder %s1023_s17, %s1019_s16  ;;  %p60_p2 = scmp.eq.s32.totalorder %s1035_s20, 0 }
   0xe   : > { %p65_p3 = scmp.ne.s32.totalorder %s1019_s16, %s1015_s15  ;;  %s1392_s23 = smov (%p45_p0, %s43_s23), 0 }
   0xf   : > { %1365 = sst [smem:[#allocation17_spill]] %s1392_s23  ;;  %p1113_p4 = por %p60_p2, %p59_p1 }
  0x10   : > { %p66_p5 = scmp.eq.s32.totalorder %s1101_s21, 0  ;;  %s47_s26 = ssub.s32 %s1031_s19, %s1392_s23 }
  0x11   : > { %p147_p6 = scmp.eq.s32.totalorder %s1101_s21, 7  ;;  %p50_p7 = scmp.eq.s32.totalorder %s47_s26, 0 }
  0x12   : > { %p1121_p8 = por %p66_p5, %p65_p3  ;;  %p153_p10 = scmp.eq.s32.totalorder %s737_s22, 7 }
  0x13   : > { %p1125_p9 = por %p147_p6, %p59_p1  ;;  %p795_p12 = scmp.lt.s32.totalorder %s1035_s20, 8 }
  0x14   : > { %s1367_s27 = scalar_select %p1121_p8, 1, 0 }
  0x15   : > { %s1368_s28 = scalar_select %p1125_p9, 1, 0 }
  0x16   : > { %s1130_s29 = scalar_select %p50_p7, %s1023_s17, %s52_s24  }
  0x17   : > { %p1132_p11 = por %p153_p10, %p65_p3  ;;  %s1356_s5 = sand.u32 1, %s1023_s17  }
  0x18   : > { %1369 = sst [smem:[#allocation18_spill]] %s1130_s29  ;;  %s1140_s6 = sshll.u32 %s1356_s5, 3 }
  0x19   : > { %s1370_s30 = scalar_select %p1132_p11, 1, 0 }
  0x1a   : > { %s1143_s7 = sshll.u32 %s1031_s19, 7  ;;  %p1147_p13 = pnand %p795_p12, %p1113_p4 }
  0x1b   : > { %1371 = sst [smem:[#allocation19_spill]] %s1370_s30  ;;  %s220_s9 = sand.u32 1, %s1035_s20  }
  0x1c   : > { %s1372_s8 = scalar_select %p1147_p13, 1, 0 }
  0x1d   : > { %s1373_s1 = sld [smem:[#allocation20_spill]]  ;;  %s224_s13 = scalar_lea.vmem [#allocation9], %s1140_s6 }
  0x1e   : > { %s232_s14 = sshll.u32 %s224_s13, 4  ;;  %s1163_s22 = scalar_lea.sflag [#allocation10], %s220_s9  ;;  %s1160_s14 = int_to_ptr.vmem [resolvable:$true] %s232_s14 }
  0x1f   : > { %p1169_p3 = pneg %p1147_p13 }
  0x23   : > { %s1156_s12 = scalar_lea.hbm %s1373_s1, %s1143_s7  ;;  %s864_s11 = scalar_lea.hbm %s1373_s1, 1024 }
  0x24   : > { %s859_s24 = scalar_lea.hbm %s1156_s12, 128  ;;  %p865_p6 = scmp.lt.u32.totalorder %s1156_s12, %s1373_s1 }
  0x25   : > { %p860_p2 = scmp.ne.s32.totalorder %s1156_s12, %s859_s24  ;;  %p866_p7 = scmp.lt.u32.totalorder %s864_s11, %s859_s24 }
  0x26   : > { %p868_p12 = scmp.lt.u32.totalorder %s859_s24, %s1156_s12 }
  0x27   : > { %p862_p4 = pnand %p1169_p3, %p860_p2  ;;  %p867_p10 = por %p866_p7, %p865_p6 }
  0x29   : > { %p863_p5 = pneg %p862_p4  ;;  %p869_p0 = por %p868_p12, %p867_p10 }
  0x2b   : > { %p870_p1 = pnand %p869_p0, %p863_p5 }
  0x2d   : > { %873 = shalt.err (!%p870_p1)
}
  0x2e   : > { %s874_s9 = scalar_lea.vmem %s1160_s14, 128  ;;  %s1037_s26 = smov [#allocation9]  }
  0x2f   : > { %p875_p2 = scmp.ne.s32.totalorder %s1160_s14, %s874_s9  ;;  %s879_s10 = sshll.u32 %s1037_s26, 4  ;;  %s880_s10 = int_to_ptr.vmem [resolvable:$false] %s879_s10 }
  0x30   : > { %s881_s5 = scalar_lea.vmem %s880_s10, 256  ;;  %p882_p9 = scmp.lt.s32.totalorder %s1160_s14, %s880_s10 }
  0x31   : > { %p877_p4 = pnand %p875_p2, %p1169_p3  ;;  %p883_p8 = scmp.lt.s32.totalorder %s881_s5, %s874_s9 }
  0x33   : > { %p878_p11 = pneg %p877_p4  ;;  %p884_p6 = por %p883_p8, %p882_p9 }
  0x35   : > { %p885_p7 = pnand %p884_p6, %p878_p11 }
  0x37   : > { %888 = shalt.err (!%p885_p7)
}
  0x38   : > { %787 = dma.hbm_to_vmem [thread:$0]  (!%p1147_p13), %s1156_s12, 128, %s1160_s14, %s1163_s22  }
  0x39   : > { %p1375_p0 = scmp.lt.s32.totalorder %s1035_s20, 9  ;;  %p1376_p1 = scmp.ge.s32.totalorder %s1035_s20, 1 }
  0x3a   : > { %s1205_s9 = scalar_lea.hbm %s1351_s0, %s1143_s7  ;;  %s205_s26 = scalar_lea.vmem [#allocation6], %s1140_s6 }
  0x3b   : > { %p1197_p5 = pnand %p1376_p1, %p1375_p0  ;;  %s213_s10 = sshll.u32 %s205_s26, 4  ;;  %s1208_s10 = int_to_ptr.vmem [resolvable:$true] %s213_s10 }
  0x3c   : > { %s1214_s5 = scalar_lea.hbm %s1353_s2, %s1143_s7  ;;  %s1378_s1 = sand.u32 1, %s1023_s17  }
  0x3d   : > { %s1377_s24 = scalar_select %p1197_p5, 1, 0 }
  0x3e   : > { %s202_s23 = scalar_lea.sflag [#allocation7], %s1378_s1  ;;  %s889_s19 = scalar_lea.hbm %s1205_s9, 128 }
  0x3f   : > { %p890_p8 = scmp.ne.s32.totalorder %s1205_s9, %s889_s19  ;;  %s894_s29 = scalar_lea.hbm %s1351_s0, 1024 }
  0x40   : > { %p895_p10 = scmp.lt.u32.totalorder %s1205_s9, %s1351_s0  ;;  %p896_p12 = scmp.lt.u32.totalorder %s894_s29, %s889_s19 }
  0x41   : > { %p892_p9 = pnand %p890_p8, %p1169_p3  ;;  %p898_p4 = scmp.lt.u32.totalorder %s889_s19, %s1205_s9 }
  0x42   : > { %p897_p2 = por %p896_p12, %p895_p10 }
  0x43   : > { %p893_p11 = pneg %p892_p9 }
  0x44   : > { %p899_p6 = por %p898_p4, %p897_p2 }
  0x46   : > { %p900_p7 = pnand %p899_p6, %p893_p11 }
  0x48   : > { %903 = shalt.err (!%p900_p7)
}
  0x49   : > { %s904_s1 = scalar_lea.vmem %s1208_s10, 128  ;;  %s1038_s7 = smov [#allocation6]  }
  0x4a   : > { %p905_p0 = scmp.ne.s32.totalorder %s1208_s10, %s904_s1  ;;  %s909_s12 = sshll.u32 %s1038_s7, 4  ;;  %s910_s12 = int_to_ptr.vmem [resolvable:$false] %s909_s12 }
  0x4b   : > { %s911_s30 = scalar_lea.vmem %s910_s12, 256  ;;  %p912_p9 = scmp.lt.s32.totalorder %s1208_s10, %s910_s12 }
  0x4c   : > { %p907_p1 = pnand %p905_p0, %p1169_p3  ;;  %p913_p5 = scmp.lt.s32.totalorder %s911_s30, %s904_s1 }
  0x4e   : > { %p908_p8 = pneg %p907_p1  ;;  %p914_p10 = por %p913_p5, %p912_p9 }
  0x50   : > { %p915_p12 = pnand %p914_p10, %p908_p8 }
  0x52   : > { %918 = shalt.err (!%p915_p12)
}
  0x53   : > { %784 = dma.hbm_to_vmem [thread:$0]  (!%p1147_p13), %s1205_s9, 128, %s1208_s10, %s202_s23  }
  0x54   : > { %s243_s19 = scalar_lea.vmem [#allocation11], %s1140_s6  ;;  %s919_s14 = scalar_lea.hbm %s1214_s5, 128 }
  0x55   : > { %s251_s29 = sshll.u32 %s243_s19, 4  ;;  %p920_p11 = scmp.ne.s32.totalorder %s1214_s5, %s919_s14  ;;  %s252_s29 = int_to_ptr.vmem [resolvable:$true] %s251_s29 }
  0x56   : > { %s924_s26 = scalar_lea.hbm %s1353_s2, 1024  ;;  %p925_p4 = scmp.lt.u32.totalorder %s1214_s5, %s1353_s2 }
  0x57   : > { %p922_p5 = pnand %p920_p11, %p1169_p3  ;;  %p926_p6 = scmp.lt.u32.totalorder %s924_s26, %s919_s14 }
  0x58   : > { %p928_p0 = scmp.lt.u32.totalorder %s919_s14, %s1214_s5 }
  0x59   : > { %p923_p2 = pneg %p922_p5  ;;  %p927_p7 = por %p926_p6, %p925_p4 }
  0x5b   : > { %p929_p1 = por %p928_p0, %p927_p7 }
  0x5d   : > { %p930_p8 = pnand %p929_p1, %p923_p2 }
  0x5f   : > { %933 = shalt.err (!%p930_p8)
}
  0x60   : > { %s934_s23 = scalar_lea.vmem %s252_s29, 128  ;;  %s1039_s6 = smov [#allocation11]  }
  0x61   : > { %p935_p9 = scmp.ne.s32.totalorder %s252_s29, %s934_s23  ;;  %s939_s9 = sshll.u32 %s1039_s6, 4  ;;  %s940_s9 = int_to_ptr.vmem [resolvable:$false] %s939_s9 }
  0x62   : > { %s941_s10 = scalar_lea.vmem %s940_s9, 256  ;;  %p942_p11 = scmp.lt.s32.totalorder %s252_s29, %s940_s9 }
  0x63   : > { %p937_p10 = pnand %p935_p9, %p1169_p3  ;;  %p943_p5 = scmp.lt.s32.totalorder %s941_s10, %s934_s23 }
  0x65   : > { %p938_p12 = pneg %p937_p10  ;;  %p944_p13 = por %p943_p5, %p942_p11 }
  0x67   : > { %p945_p4 = pnand %p944_p13, %p938_p12 }
  0x69   : > { %948 = shalt.err (!%p945_p4)
}
  0x6a   : > { %p1379_p6 = scmp.ne.s32.totalorder %s1372_s8, 0  ;;  %p1380_p2 = scmp.ne.s32.totalorder %s1377_s24, 0 }
  0x6b   : > { %s1261_s25 = sand.u32 (!%p1380_p2), 1, %s1019_s16   ;;  %p1381_p13 = scmp.ne.s32.totalorder (!%p1380_p2), %s1367_s27, 0 }
  0x6c   : > { %790 = dma.hbm_to_vmem [thread:$0]  (!%p1379_p6), %s1214_s5, 128, %s252_s29, %s1163_s22  }
  0x6d   : > { %260 = sbr.rel (%p1380_p2) target bundleno = 939 (0x3ab), region = 32  ;;  %s1264_s12 = sshll.u32 (!%p1380_p2), %s1261_s25, 3 }
  0x6e   : > { %s263_s30 = scalar_lea.sflag (!%p1380_p2), [#allocation7], %s1261_s25  ;;  %s266_s19 = scalar_lea.vmem (!%p1380_p2), [#allocation6], %s1264_s12 }
  0x74   : > { %1002 = dma.done.wait (%p1381_p13), %s263_s30, 128  }
  0x75   : > { %1004 = vsyncadd (%p1381_p13), %s263_s30, 4294967168  ;;  %s271_s8 = sand.u32 1, %s1101_s21   ;;  %s275_s24 = scalar_lea.vmem [#allocation9], %s1264_s12 }
  0x76   : > { %s272_s22 = scalar_lea.sflag [#allocation10], %s271_s8 }
  0x77   : > { %1006 = dma.done.wait (%p1381_p13), %s272_s22, 256  }
  0x78   : > { %1008 = vsyncadd (%p1381_p13), %s272_s22, 4294967040  ;;  %vm339_vm0 = vcmask 261120   ;;  %v1040_v0 = vmov 0.0   ;;  %vm1041_vm1 = vmmov 0   ;;  %v337_v1 = vld [vmem:[%s266_s19] sm:$0xff]  ;;  %v346_v2 = vld [vmem:[%s275_s24] sm:$0xff] }
  0x79   : > { %763 = vmatprep.subr.mxu0 %v1040_v0  ;;  %344 = vst.msk [vmem:[#allocation5] sm:$0xff] %vm339_vm0, %v1040_v0  ;;  %765 = vmatprep.mubr.msk.f32.mxu0 %vm1041_vm1, %v1040_v0  ;;  %v338_v3 = vmul.f32 0.17677669, %v337_v1  ;;  %vm341_vm2 = vcmask 7168   ;;  %v1042_v5 = vmov -inf   ;;  %vm425_vm3 = vcmask 64512  }
  0x7a   : > { %768 = vmatprep.subr.mxu1 %v1040_v0  ;;  %770 = vmatprep.mubr.msk.f32.mxu1 %vm1041_vm1, %v1040_v0  ;;  %342 = vst.msk [vmem:[#allocation3] sm:$0xff] %vm341_vm2, %v1042_v5  ;;  %343 = vst.msk [vmem:[#allocation4] sm:$0xff] %vm341_vm2, %v1040_v0  ;;  %v1043_v9 = vmov 0   ;;  %s284_s21 = scalar_lea.vmem [#allocation11], %s1264_s12  ;;  %p326_p3 = scmp.lt.s32.totalorder %s1027_s18, 7 }
  0x7b   : > { %764 = vmatpush3.xpose.msk.msra.mxu0 %vm339_vm0, %v346_v2  ;;  %340 = vst.msk [vmem:[#allocation2] sm:$0xff] %vm339_vm0, %v338_v3  ;;  %849 = vset.pattern.permute.xlu0 %v1043_v9  ;;  %v456_v14 = vld [vmem:[%s284_s21] sm:$0xff]  ;;  %s756_s13 = sshll.u32 %s1027_s18, 7  ;;  %s316_s26 = scalar_lea.vmem [#allocation12], %s1264_s12 }
  0x7c   : > { %850 = vset.pattern.permute.xlu1 %v1043_v9  ;;  %769 = vmatpush3.msra.mxu1 %v456_v14  ;;  %s327_s27 = scalar_select %p326_p3, %s1027_s18, 7 }
  0x7d   : > { %s574_s1 = sshll.u32 %s316_s26, 4  ;;  %s1302_s6 = scalar_lea.hbm %s1354_s3, %s756_s13  ;;  %s1304_s1 = int_to_ptr.vmem [resolvable:$true] %s574_s1 }
  0x7e   : > { %s751_s5 = sshll.u32 %s327_s27, 3  ;;  %s553_s9 = scalar_lea.sflag [#allocation8], %s1261_s25 }
  0x7f   : > { %s332_s11 = scalar_lea.vmem %s1355_s4, %s751_s5  ;;  %s949_s10 = scalar_lea.vmem %s1304_s1, 128 }
  0x80   : > { %v449_v31 = vld [vmem:[#allocation5] sm:$0xff]  ;;  %p950_p7 = scmp.ne.s32.totalorder %s1304_s1, %s949_s10  ;;  %p1382_p0 = scmp.ne.s32.totalorder %s1368_s28, 0 }
  0x81   : > { %v424_v10 = vld [vmem:[#allocation3] sm:$0xff]  ;;  %v441_v22 = vld [vmem:[#allocation4] sm:$0xff]  ;;  %s1044_s18 = smov [#allocation12]  }
  0x82   : > { %v345_v4 = vld [vmem:[#allocation2] sm:$0xff]  ;;  %p951_p1 = pnand %p950_p7, %p1382_p0  ;;  %s953_s12 = sshll.u32 %s1044_s18, 4  ;;  %s954_s12 = int_to_ptr.vmem [resolvable:$false] %s953_s12 }
  0x83   : > { %766 = vmatmul.mubr.msk.f32.vlgmr.msra.gmra.mrb[0].mxu0 %vm339_vm0, %v345_v4  ;;  %s955_s30 = scalar_lea.vmem %s954_s12, 256  ;;  %p956_p9 = scmp.lt.s32.totalorder %s1304_s1, %s954_s12 }
  0x84   : > { %p952_p8 = pneg %p951_p1  ;;  %p957_p10 = scmp.lt.s32.totalorder %s955_s30, %s949_s10 }
  0x86   : > { %p958_p12 = por %p957_p10, %p956_p9 }
  0x88   : > { %p959_p11 = pnand %p958_p12, %p952_p8 }
 0x156   : > { %v420_v6 = vpop.f32.mrb[0].mxu0 }
 0x157   : > { %v767_v7 = vpop.f32.mrb[1].mxu0  ;;  %v426_v8 = vsel %vm425_vm3, %v420_v6, -inf }
 0x158   : > { %427 = vmax.xlane.f32.xlu0 %v426_v8 }
 0x1e5   : > { %v428_v11 = vpop.xlane.xlu0 %427 }
 0x1e6   : > { %v429_v12 = vmax.f32 %v424_v10, %v428_v11 }
 0x1e8   : > { %v430_v13 = vsub.f32 %v424_v10, %v429_v12  ;;  %532 = vst.msk [vmem:[#allocation3] sm:$0xff] %vm341_vm2, %v429_v12  ;;  %435 = vperm.xlu0 %849, %v429_v12  }
 0x1ea   : > { %v431_v20 = vmul.f32 1.442695, %v430_v13 }
 0x1ef   : > { %v546_v29 = vld [vmem:[#allocation3] sm:$0xff] }
 0x267   : > { %v436_v15 = vpop.permute.xlu0 %435 }
 0x268   : > { %v438_v16 = vsub.f32 %v420_v6, %v436_v15 }
 0x26a   : > { %v439_v17 = vmul.f32 1.442695, %v438_v16 }
 0x26c   : > { %851 = vpow2.f32 %v439_v17 }
 0x26d   : > { %853 = vpow2.f32 %v431_v20 }
 0x276   : > { %v852_v18 = vpop.eup %851 }
 0x277   : > { %771 = vmatmul.mubr.msk.f32.vlgmr.msra.gmra.mrb[0].mxu1 %vm425_vm3, %v852_v18  ;;  %v443_v19 = vsel %vm425_vm3, %v852_v18, 0.0  ;;  %v854_v21 = vpop.eup %853 }
 0x278   : > { %444 = vadd.xlane.f32.xlu1 %v443_v19  ;;  %v442_v23 = vmul.f32 %v854_v21, %v441_v22 }
 0x289   : > { %452 = vperm.xlu1 %850, %v854_v21  }
 0x305   : > { %v445_v24 = vpop.xlane.xlu1 %444 }
 0x306   : > { %v446_v25 = vadd.f32 %v445_v24, %v442_v23 }
 0x308   : > { %448 = vst.msk [vmem:[#allocation4] sm:$0xff] %vm341_vm2, %v446_v25 }
 0x309   : > { %v453_v32 = vpop.permute.xlu1 %452 }
 0x30a   : > { %v455_v33 = vmul.f32 %v453_v32, %v449_v31 }
 0x30f   : > { %v547_v26 = vld [vmem:[#allocation4] sm:$0xff] }
 0x310   : > { %855 = vlog2.f32 %v547_v26  ;;  %540 = vperm.xlu1 %850, %v547_v26  }
 0x31a   : > { %v856_v27 = vpop.eup %855 }
 0x31b   : > { %v549_v28 = vmul.f32 0.6931472, %v856_v27 }
 0x31d   : > { %v550_v30 = vadd.f32 %v549_v28, %v546_v29 }
 0x31f   : > { %551 = vst.msk [vmem:[%s332_s11] sm:$0xff] %vm341_vm2, %v550_v30 }
 0x34a   : > { %v526_v34 = vpop.f32.mrb[0].mxu1 }
 0x34b   : > { %v530_v35 = vadd.f32 %v526_v34, %v455_v33  ;;  %v772_v36 = vpop.f32.mrb[1].mxu1 }
 0x34d   : > { %531 = vst.msk [vmem:[#allocation5] sm:$0xff] %vm339_vm0, %v530_v35 }
 0x354   : > { %v536_v39 = vld [vmem:[#allocation5] sm:$0xff] }
 0x38f   : > { %v541_v37 = vpop.permute.xlu1 %540 }
 0x390   : > { %857 = vrcp.f32 %v541_v37 }
 0x39a   : > { %v858_v38 = vpop.eup %857 }
 0x39b   : > { %v544_v40 = vmul.f32 %v858_v38, %v536_v39 }
 0x39d   : > { %545 = vst.msk [vmem:[%s316_s26] sm:$0xff] %vm339_vm0, %v544_v40 }
 0x39e   : > { %962 = shalt.err (!%p959_p11)
}
 0x39f   : > { %s963_s25 = scalar_lea.hbm %s1302_s6, 128  ;;  %s967_s22 = scalar_lea.hbm %s1354_s3, 1024 }
 0x3a0   : > { %p964_p5 = scmp.ne.s32.totalorder %s1302_s6, %s963_s25  ;;  %p968_p2 = scmp.lt.u32.totalorder %s1302_s6, %s1354_s3 }
 0x3a1   : > { %p969_p13 = scmp.lt.u32.totalorder %s967_s22, %s963_s25  ;;  %p971_p7 = scmp.lt.u32.totalorder %s963_s25, %s1302_s6 }
 0x3a2   : > { %p965_p4 = pnand %p964_p5, %p1382_p0 }
 0x3a3   : > { %p970_p3 = por %p969_p13, %p968_p2 }
 0x3a4   : > { %p966_p6 = pneg %p965_p4 }
 0x3a5   : > { %p972_p1 = por %p971_p7, %p970_p3 }
 0x3a7   : > { %p973_p8 = pnand %p972_p1, %p966_p6 }
 0x3a9   : > { %976 = shalt.err (!%p973_p8)
}
 0x3aa   : > { %779 = dma.vmem_to_hbm [thread:$0]  (%p1382_p0), %s1304_s1, 128, %s1302_s6, %s553_s9  }
 0x3ab PF: > { %s1383_s27 = sld [smem:[#allocation19_spill]]  ;;  %p796_p9 = scmp.ge.s32.totalorder %s1035_s20, 2 }
 0x3ac   : > { %s589_s5 = sand.u32 1, %s1015_s15  }
 0x3ad   : > { %s590_s29 = scalar_lea.sflag [#allocation8], %s589_s5 }
 0x3b1   : > { %p1384_p10 = scmp.ne.s32.totalorder %s1383_s27, 0 }
 0x3b3   : > { %p792_p12 = pnand %p796_p9, %p1384_p10 }
 0x3b5   : > { %1010 = dma.done.wait (!%p792_p12), %s590_s29, 128  }
 0x3b6   : > { %1012 = vsyncadd (!%p792_p12), %s590_s29, 4294967168  ;;  %s24_s20 = sadd.s32 1, %s1035_s20   ;;  %s1385_s28 = sld [smem:[#allocation18_spill]] }
 0x3b7   : > { %p21_p11 = scmp.ge.s32.totalorder %s24_s20, 10   ;;  %s1386_s18 = sld [smem:[#allocation16_spill]] }
 0x3b8   : > { %s1387_s19 = sld [smem:[#allocation17_spill]]  ;;  %s1388_s15 = smov %s1019_s16 }
 0x3b9   : > { %s1389_s16 = smov %s1023_s17  ;;  %23 = sbr.rel (!%p21_p11) target bundleno = 10 (0xa), region = 121 }
 0x3bc   : > { %s1390_s17 = smov %s1385_s28 }
 0x3c0   :  { %605 = vsyncpa [#allocation7], 1 }
 0x3c1   :  { %607 = vsyncpa [#allocation7 + $0x1], 1 }
 0x3c2   :  { %608 = vsyncpa [#allocation10], 1 }
 0x3c3   :  { %610 = vsyncpa [#allocation10 + $0x1], 1 }
 0x3c4   :  { %611 = vsyncpa [#allocation8], 1 }
 0x3c5   :  { %613 = vsyncpa [#allocation8 + $0x1], 1 }

</bundles_post_ra>
